<compile_context>
chip_gen: v5e
topology: v5e:2x2
jax: 0.10.0
libtpu: 0.0.40
codegen_flags: <defaults>
</compile_context>

<pallas_src>
import functools

import jax
import jax.numpy as jnp
from jax.experimental import pallas as pl
from jax.experimental.pallas import tpu as pltpu

BN_EPS = 1e-5
NEG_SLOPE = 0.2
NUM_STAT_SHARDS = 2   # leading "parallel" grid axis -> pass 1 can use both v7x TensorCores
STAT_ROWS = 8         # sublane-aligned accumulator rows per stat shard


def _round_up(x, m):
    return (x + m - 1) // m * m


def _cdiv(a, b):
    return -(-a // b)


def _vmem_budget_bytes():
    # Generation-aware budget: half of physical VMEM (v5e/v6e: 128 MiB -> 64; v7x: 64 MiB -> 32).
    try:
        phys = int(pltpu.get_tpu_info().vmem_capacity_bytes)
    except Exception:
        phys = 64 << 20  # conservative fallback (v7x per-TC VMEM)
    return max(16 << 20, phys // 2)


def _pick_tm(m_rows, kp, cp, budget_bytes):
    # Per-row VMEM for pass 1: bf16 x tile double-buffered (4*kp) + bf16 y tile double-buffered
    # (4*cp) + in-kernel f32 y / y*y temporaries (~8*cp).
    per_row = 4 * kp + 12 * cp
    w_bytes = 2 * kp * cp * 2               # weights, double-buffered bf16
    avail = budget_bytes - w_bytes - (2 << 20)
    tm = avail // per_row if avail > 0 else 16
    tm = min(tm, 2048)                      # diminishing returns past ~2K rows / grid step
    per_core = _round_up(_cdiv(m_rows, NUM_STAT_SHARDS), 16)
    tm = min(tm, per_core)                  # don't overshoot the per-core work
    if tm >= 256:
        tm = tm // 256 * 256                # friendly to the 256x256 MXU (v6e/v7x)
    else:
        tm = max(16, tm // 16 * 16)         # bf16 sublane packing
    return tm


def _pick_spatial_tile(s_total, cp, budget_bytes):
    """Spatial tile for pass 2: must divide Ho*Wo and keep the output lane dim 128-aligned
    (or cover the whole image).  Returns None if no clean tiling exists (fallback path)."""
    if s_total % 8 != 0:
        return None
    cap = max(128, min(4096, budget_bytes // (24 * cp)))
    if s_total <= cap:
        return s_total
    best = None
    for d in range(128, cap + 1, 128):
        if s_total % d == 0:
            best = d
    return best


# --------------------------------------------------------------------------- #
# Pass 1: conv-as-matmul + per-channel sum / sum-of-squares accumulation.
# --------------------------------------------------------------------------- #
def _conv_stats_kernel(x_ref, w_ref, y_ref, sum_ref, sq_ref):
    # x_ref:   (tm, Kp) bf16 im2col tile
    # w_ref:   (Kp, Cp) bf16 weights (constant index -> resident in VMEM)
    # y_ref:   (tm, Cp) bf16 raw conv output tile (stats taken from the f32 value below)
    # sum_ref: (8, Cp)  f32 per-channel sum   (resident accumulator; one shard per parallel core)
    # sq_ref:  (8, Cp)  f32 per-channel sumsq
    @pl.when(pl.program_id(1) == 0)
    def _():
        sum_ref[...] = jnp.zeros_like(sum_ref)
        sq_ref[...] = jnp.zeros_like(sq_ref)

    y = jnp.dot(x_ref[...], w_ref[...], preferred_element_type=jnp.float32)
    y_ref[...] = y.astype(y_ref.dtype)                       # bf16 intermediate to HBM
    # Single sweep over the f32 tile for both statistics.
    sum_ref[0:1, :] += jnp.sum(y, axis=0, keepdims=True)
    sq_ref[0:1, :] += jnp.sum(y * y, axis=0, keepdims=True)


# --------------------------------------------------------------------------- #
# Pass 2: BatchNorm (folded per-channel scale/shift) + LeakyReLU(0.2).
# --------------------------------------------------------------------------- #
def _bn_scale_shift(sum_ref, sq_ref, gamma_ref, beta_ref, inv_m, eps):
    mean = sum_ref[...] * inv_m
    var = sq_ref[...] * inv_m - mean * mean          # biased (training-mode) variance
    scale = gamma_ref[...] * jax.lax.rsqrt(var + eps)
    shift = beta_ref[...] - mean * scale
    return scale, shift


def _bn_lrelu_nchw_kernel(y_ref, sum_ref, sq_ref, gamma_ref, beta_ref, o_ref, *,
                          inv_m, eps, neg_slope):
    # y_ref: (ts, Cp) bf16; o_ref: (1, Cp, ts) bf16 — NCHW layout folded into the store.
    scale, shift = _bn_scale_shift(sum_ref, sq_ref, gamma_ref, beta_ref, inv_m, eps)
    z = y_ref[...].astype(jnp.float32) * scale + shift       # one FMA per element
    z = jnp.where(z >= 0, z, neg_slope * z)
    o_ref[0] = z.T.astype(o_ref.dtype)                       # XLU transpose (mem-bound pass)


def _bn_lrelu_flat_kernel(y_ref, sum_ref, sq_ref, gamma_ref, beta_ref, o_ref, *,
                          inv_m, eps, neg_slope):
    scale, shift = _bn_scale_shift(sum_ref, sq_ref, gamma_ref, beta_ref, inv_m, eps)
    z = y_ref[...].astype(jnp.float32) * scale + shift
    o_ref[...] = jnp.where(z >= 0, z, neg_slope * z).astype(o_ref.dtype)


# --------------------------------------------------------------------------- #
# Wrapper: im2col (layout plumbing) + two pallas_calls.
# --------------------------------------------------------------------------- #
def _im2col(x, kh, kw, stride, pad):
    # x: (N, C, H, W) -> (N*Ho*Wo, C*kh*kw); columns ordered (cin, kh, kw) to match OIHW weights.
    n, c, h, w = x.shape
    ho = (h + 2 * pad - kh) // stride + 1
    wo = (w + 2 * pad - kw) // stride + 1
    xp = jnp.pad(x, ((0, 0), (0, 0), (pad, pad), (pad, pad)))
    patches = []
    for ki in range(kh):
        for kj in range(kw):
            patches.append(
                xp[:, :, ki: ki + stride * ho: stride, kj: kj + stride * wo: stride]
            )  # (N, C, Ho, Wo)
    p = jnp.stack(patches, axis=2)                 # (N, C, kh*kw, Ho, Wo)
    p = p.reshape(n, c, kh, kw, ho, wo)
    p = jnp.transpose(p, (0, 4, 5, 1, 2, 3))       # (N, Ho, Wo, C, kh, kw)
    return p.reshape(n * ho * wo, c * kh * kw), ho, wo


def dcgan_conv_forward(x, weight, bias, gamma, beta):
    """x: (N, nin, H, W) f32; weight: (nout, nin, 4, 4); bias/gamma/beta: (nout,).

    Returns (N, nout, H//2, W//2) in bf16 (the dtype the next DCGAN layer consumes)."""
    del bias  # training-mode BN subtracts the per-channel mean -> conv bias cancels exactly
    n, nin, h, w = x.shape
    nout = weight.shape[0]
    kh = kw = 4

    # im2col built directly in bf16 (the MXU operand dtype).
    xcol, ho, wo = _im2col(x.astype(jnp.bfloat16), kh, kw, stride=2, pad=1)   # (M, K) bf16
    m_rows, k_dim = xcol.shape
    s_total = ho * wo

    cp = _round_up(nout, 128)     # lane-dense channels
    kp = _round_up(k_dim, 128)    # lane-dense contraction dim

    budget = _vmem_budget_bytes()
    tm = _pick_tm(m_rows, kp, cp, budget)
    tiles_per_core = _cdiv(_cdiv(m_rows, NUM_STAT_SHARDS), tm)
    mp = NUM_STAT_SHARDS * tiles_per_core * tm

    # Single padded copies; padded rows/cols are zero -> no effect on matmul or stats.
    xcol_p = jnp.zeros((mp, kp), jnp.bfloat16).at[:m_rows, :k_dim].set(xcol)
    wmat_p = jnp.zeros((kp, cp), jnp.bfloat16).at[:k_dim, :nout].set(
        weight.reshape(nout, k_dim).T.astype(jnp.bfloat16))
    gamma_p = jnp.zeros((1, cp), jnp.float32).at[0, :nout].set(gamma.astype(jnp.float32))
    beta_p = jnp.zeros((1, cp), jnp.float32).at[0, :nout].set(beta.astype(jnp.float32))

    # ---- Pass 1: conv matmul (bf16 MXU, f32 acc) + per-channel stats -------------------------
    p1_vmem = int(min(budget, max(2 * kp * cp * 2 + tm * (4 * kp + 12 * cp) + (4 << 20),
                                  16 << 20)))
    y_flat, sum_parts, sq_parts = pl.pallas_call(
        _conv_stats_kernel,
        grid=(NUM_STAT_SHARDS, tiles_per_core),
        in_specs=[
            pl.BlockSpec((tm, kp), lambda c, i: (c * tiles_per_core + i, 0)),
            pl.BlockSpec((kp, cp), lambda c, i: (0, 0)),       # weights (resident)
        ],
        out_specs=[
            pl.BlockSpec((tm, cp), lambda c, i: (c * tiles_per_core + i, 0)),
            pl.BlockSpec((STAT_ROWS, cp), lambda c, i: (c, 0)),  # per-shard sum accumulator
            pl.BlockSpec((STAT_ROWS, cp), lambda c, i: (c, 0)),  # per-shard sumsq accumulator
        ],
        out_shape=(
            jax.ShapeDtypeStruct((mp, cp), jnp.bfloat16),        # bf16 intermediate
            jax.ShapeDtypeStruct((NUM_STAT_SHARDS * STAT_ROWS, cp), jnp.float32),
            jax.ShapeDtypeStruct((NUM_STAT_SHARDS * STAT_ROWS, cp), jnp.float32),
        ),
        compiler_params=pltpu.CompilerParams(
            dimension_semantics=("parallel", "arbitrary"),       # shard axis / accumulate axis
            vmem_limit_bytes=p1_vmem,
        ),
        cost_estimate=pl.CostEstimate(
            flops=2 * mp * kp * cp,
            transcendentals=0,
            bytes_accessed=mp * kp * 2 + kp * cp * 2 + mp * cp * 2,
        ),
    )(xcol_p, wmat_p)

    # Combine the per-shard partial statistics (tiny: 2*8 rows x Cp).
    ch_sum = jnp.sum(sum_parts, axis=0, keepdims=True)
    ch_sq = jnp.sum(sq_parts, axis=0, keepdims=True)
    inv_m = 1.0 / float(m_rows)

    # ---- Pass 2: folded BN scale/shift + LeakyReLU ---------------------------------------------
    ts = _pick_spatial_tile(s_total, cp, budget)
    if ts is not None:
        # NCHW layout folded into the out_spec: each (ts, Cp) tile is transposed in-kernel and
        # written as a (1, Cp, ts) block of an (N, Cp, Ho*Wo) output -> no XLA transpose pass.
        blocks_per_img = s_total // ts
        kernel2 = functools.partial(_bn_lrelu_nchw_kernel,
                                    inv_m=inv_m, eps=BN_EPS, neg_slope=NEG_SLOPE)
        p2_vmem = int(min(budget, max(24 * ts * cp + (2 << 20), 16 << 20)))
        out_nchw = pl.pallas_call(
            kernel2,
            grid=(n, blocks_per_img),
            in_specs=[
                pl.BlockSpec((ts, cp), lambda b, s: (b * blocks_per_img + s, 0)),
                pl.BlockSpec((1, cp), lambda b, s: (0, 0)),      # sum
                pl.BlockSpec((1, cp), lambda b, s: (0, 0)),      # sumsq
                pl.BlockSpec((1, cp), lambda b, s: (0, 0)),      # gamma
                pl.BlockSpec((1, cp), lambda b, s: (0, 0)),      # beta
            ],
            out_specs=pl.BlockSpec((1, cp, ts), lambda b, s: (b, 0, s)),
            out_shape=jax.ShapeDtypeStruct((n, cp, s_total), jnp.bfloat16),
            compiler_params=pltpu.CompilerParams(
                dimension_semantics=("parallel", "parallel"),
                vmem_limit_bytes=p2_vmem,
            ),
            cost_estimate=pl.CostEstimate(
                flops=4 * n * s_total * cp,
                transcendentals=cp,
                bytes_accessed=mp * cp * 2 + n * cp * s_total * 2,
            ),
        )(y_flat, ch_sum, ch_sq, gamma_p, beta_p)
        out = out_nchw.reshape(n, cp, ho, wo)                    # free reshape
        return out[:, :nout] if nout != cp else out

    # Fallback (Ho*Wo not sublane-aligned): flat pass 2, NCHW transpose left to XLA.
    kernel2 = functools.partial(_bn_lrelu_flat_kernel,
                                inv_m=inv_m, eps=BN_EPS, neg_slope=NEG_SLOPE)
    p2_vmem = int(min(budget, max(16 * tm * cp + (2 << 20), 16 << 20)))
    out_flat = pl.pallas_call(
        kernel2,
        grid=(mp // tm,),
        in_specs=[
            pl.BlockSpec((tm, cp), lambda i: (i, 0)),
            pl.BlockSpec((1, cp), lambda i: (0, 0)),
            pl.BlockSpec((1, cp), lambda i: (0, 0)),
            pl.BlockSpec((1, cp), lambda i: (0, 0)),
            pl.BlockSpec((1, cp), lambda i: (0, 0)),
        ],
        out_specs=pl.BlockSpec((tm, cp), lambda i: (i, 0)),
        out_shape=jax.ShapeDtypeStruct((mp, cp), jnp.bfloat16),
        input_output_aliases={0: 0},                             # bf16 in / bf16 out -> alias OK
        compiler_params=pltpu.CompilerParams(
            dimension_semantics=("parallel",),
            vmem_limit_bytes=p2_vmem,
        ),
    )(y_flat, ch_sum, ch_sq, gamma_p, beta_p)
    out = out_flat[:m_rows, :nout].reshape(n, ho, wo, nout)
    return jnp.transpose(out, (0, 3, 1, 2))


# --------------------------------------------------------------------------- #
# Pure-JAX reference (PyTorch training-mode semantics).
# --------------------------------------------------------------------------- #
def _reference(x, weight, bias, gamma, beta):
    y = jax.lax.conv_general_dilated(
        x, weight, window_strides=(2, 2), padding=((1, 1), (1, 1)),
        dimension_numbers=("NCHW", "OIHW", "NCHW"))
    y = y + bias[None, :, None, None]
    mean = y.mean(axis=(0, 2, 3), keepdims=True)
    var = ((y - mean) ** 2).mean(axis=(0, 2, 3), keepdims=True)   # biased variance
    y_hat = (y - mean) * jax.lax.rsqrt(var + BN_EPS)
    z = gamma[None, :, None, None] * y_hat + beta[None, :, None, None]
    return jnp.where(z >= 0, z, NEG_SLOPE * z)


if __name__ == "__main__":
    key = jax.random.PRNGKey(0)
    k_x, k_w, k_b = jax.random.split(key, 3)

    N, NIN, NOUT, H, W = 2, 4, 8, 16, 16
    x = jax.random.normal(k_x, (N, NIN, H, W), dtype=jnp.float32)

    # Deterministic DCGAN-style init; PyTorch BN defaults gamma=1, beta=0.
    weight = 0.02 * jax.random.normal(k_w, (NOUT, NIN, 4, 4), dtype=jnp.float32)
    bias = 0.01 * jax.random.normal(k_b, (NOUT,), dtype=jnp.float32)
    gamma = jnp.ones((NOUT,), dtype=jnp.float32)
    beta = jnp.zeros((NOUT,), dtype=jnp.float32)

    fwd = jax.jit(dcgan_conv_forward)
    out = jax.block_until_ready(fwd(x, weight, bias, gamma, beta))
    ref = jax.block_until_ready(_reference(x, weight, bias, gamma, beta))

    assert out.shape == (N, NOUT, H // 2, W // 2), out.shape
    # Kernel uses bf16 MXU operands, a bf16 intermediate and a bf16 output -> bf16-level tolerance.
    out_f32 = out.astype(jnp.float32)
    err = float(jnp.max(jnp.abs(out_f32 - ref)))
    assert jnp.allclose(out_f32, ref, rtol=4e-2, atol=4e-2), err
    print("KERNEL_OK")
</pallas_src>

<mosaic_0001>
module attributes {stable_mosaic.version = 11 : i64} {
  func.func @_conv_stats_kernel(%arg0: i32, %arg1: i32, %arg2: memref<64x128xbf16, #tpu.memory_space<vmem>>, %arg3: memref<128x128xbf16, #tpu.memory_space<vmem>>, %arg4: memref<64x128xbf16, #tpu.memory_space<vmem>>, %arg5: memref<8x128xf32, #tpu.memory_space<vmem>>, %arg6: memref<8x128xf32, #tpu.memory_space<vmem>>) attributes {dimension_semantics = [#tpu.dimension_semantics<parallel>, #tpu.dimension_semantics<arbitrary>], iteration_bounds = array<i64: 2, 1>, scalar_prefetch = 0 : i64, scratch_operands = 0 : i64, tpu.core_type = #tpu.core_type<tc>, window_params = [{transform_indices = @transform_0, window_bounds = array<i64: 64, 128>}, {pipeline_mode = #tpu.pipeline_mode<synchronous>, transform_indices = @transform_1, window_bounds = array<i64: 128, 128>}, {transform_indices = @transform_2, window_bounds = array<i64: 64, 128>}, {transform_indices = @transform_3, window_bounds = array<i64: 8, 128>}, {transform_indices = @transform_4, window_bounds = array<i64: 8, 128>}]} {
    %c0_i32 = arith.constant 0 : i32
    %0 = arith.cmpi eq, %arg1, %c0_i32 : i32
    %1 = arith.extui %0 : i1 to i32
    %c0_i32_0 = arith.constant 0 : i32
    %2 = arith.cmpi ne, %1, %c0_i32_0 : i32
    scf.if %2 {
      %cst_16 = arith.constant 0.000000e+00 : f32
      %19 = vector.broadcast %cst_16 : f32 to vector<8x128xf32>
      %c0_17 = arith.constant 0 : index
      %c0_18 = arith.constant 0 : index
      %20 = vector.load %arg5[%c0_17, %c0_18] : memref<8x128xf32, #tpu.memory_space<vmem>>, vector<8x128xf32>
      tpu.vector_store %arg5[%c0_17, %c0_18], %19 {strides = array<i32>} : memref<8x128xf32, #tpu.memory_space<vmem>>, vector<8x128xf32>,
      %cst_19 = arith.constant 0.000000e+00 : f32
      %21 = vector.broadcast %cst_19 : f32 to vector<8x128xf32>
      %c0_20 = arith.constant 0 : index
      %c0_21 = arith.constant 0 : index
      %22 = vector.load %arg6[%c0_20, %c0_21] : memref<8x128xf32, #tpu.memory_space<vmem>>, vector<8x128xf32>
      tpu.vector_store %arg6[%c0_20, %c0_21], %21 {strides = array<i32>} : memref<8x128xf32, #tpu.memory_space<vmem>>, vector<8x128xf32>,
    } else {
    }
    %c0 = arith.constant 0 : index
    %c0_1 = arith.constant 0 : index
    %3 = vector.load %arg2[%c0, %c0_1] : memref<64x128xbf16, #tpu.memory_space<vmem>>, vector<64x128xbf16>
    %c0_2 = arith.constant 0 : index
    %c0_3 = arith.constant 0 : index
    %4 = vector.load %arg3[%c0_2, %c0_3] : memref<128x128xbf16, #tpu.memory_space<vmem>>, vector<128x128xbf16>
    %cst = arith.constant dense<0.000000e+00> : vector<64x128xf32>
    %5 = tpu.matmul %3, %4, %cst {dimension_numbers = #tpu.dot_dimension_numbers<[1], [0], [0], [1], [0, 0, 1, 1], [], []>} : vector<64x128xbf16>, vector<128x128xbf16>, vector<64x128xf32> -> vector<64x128xf32>
    %6 = arith.truncf %5 : vector<64x128xf32> to vector<64x128xbf16>
    %c0_4 = arith.constant 0 : index
    %c0_5 = arith.constant 0 : index
    %7 = vector.load %arg4[%c0_4, %c0_5] : memref<64x128xbf16, #tpu.memory_space<vmem>>, vector<64x128xbf16>
    tpu.vector_store %arg4[%c0_4, %c0_5], %6 {strides = array<i32>} : memref<64x128xbf16, #tpu.memory_space<vmem>>, vector<64x128xbf16>,
    %c0_6 = arith.constant 0 : index
    %c0_7 = arith.constant 0 : index
    %8 = vector.load %arg5[%c0_6, %c0_7] : memref<8x128xf32, #tpu.memory_space<vmem>>, vector<1x128xf32>
    %cst_8 = arith.constant dense<0.000000e+00> : vector<128xf32>
    %9 = vector.multi_reduction <add>, %5, %cst_8 [0] : vector<64x128xf32> to vector<128xf32>
    %10 = vector.shape_cast %9 : vector<128xf32> to vector<1x128xf32>
    %11 = arith.addf %8, %10 : vector<1x128xf32>
    %c0_9 = arith.constant 0 : index
    %c0_10 = arith.constant 0 : index
    %12 = vector.load %arg5[%c0_9, %c0_10] : memref<8x128xf32, #tpu.memory_space<vmem>>, vector<1x128xf32>
    tpu.vector_store %arg5[%c0_9, %c0_10], %11 {strides = array<i32>} : memref<8x128xf32, #tpu.memory_space<vmem>>, vector<1x128xf32>,
    %c0_11 = arith.constant 0 : index
    %c0_12 = arith.constant 0 : index
    %13 = vector.load %arg6[%c0_11, %c0_12] : memref<8x128xf32, #tpu.memory_space<vmem>>, vector<1x128xf32>
    %14 = arith.mulf %5, %5 : vector<64x128xf32>
    %cst_13 = arith.constant dense<0.000000e+00> : vector<128xf32>
    %15 = vector.multi_reduction <add>, %14, %cst_13 [0] : vector<64x128xf32> to vector<128xf32>
    %16 = vector.shape_cast %15 : vector<128xf32> to vector<1x128xf32>
    %17 = arith.addf %13, %16 : vector<1x128xf32>
    %c0_14 = arith.constant 0 : index
    %c0_15 = arith.constant 0 : index
    %18 = vector.load %arg6[%c0_14, %c0_15] : memref<8x128xf32, #tpu.memory_space<vmem>>, vector<1x128xf32>
    tpu.vector_store %arg6[%c0_14, %c0_15], %17 {strides = array<i32>} : memref<8x128xf32, #tpu.memory_space<vmem>>, vector<1x128xf32>,
    return
  }
  func.func @transform_0(%arg0: i32, %arg1: i32) -> (i32, i32) {
    %c1_i32 = arith.constant 1 : i32
    %0 = arith.muli %arg0, %c1_i32 : i32
    %1 = arith.addi %0, %arg1 : i32
    %c0_i32 = arith.constant 0 : i32
    %c0_i32_0 = arith.constant 0 : i32
    return %1, %c0_i32 : i32, i32
  }
  func.func @transform_1(%arg0: i32, %arg1: i32) -> (i32, i32) {
    %c0_i32 = arith.constant 0 : i32
    %c0_i32_0 = arith.constant 0 : i32
    %c0_i32_1 = arith.constant 0 : i32
    return %c0_i32, %c0_i32_0 : i32, i32
  }
  func.func @transform_2(%arg0: i32, %arg1: i32) -> (i32, i32) {
    %c1_i32 = arith.constant 1 : i32
    %0 = arith.muli %arg0, %c1_i32 : i32
    %1 = arith.addi %0, %arg1 : i32
    %c0_i32 = arith.constant 0 : i32
    %c0_i32_0 = arith.constant 0 : i32
    return %1, %c0_i32 : i32, i32
  }
  func.func @transform_3(%arg0: i32, %arg1: i32) -> (i32, i32) {
    %c0_i32 = arith.constant 0 : i32
    %c0_i32_0 = arith.constant 0 : i32
    return %arg0, %c0_i32 : i32, i32
  }
  func.func @transform_4(%arg0: i32, %arg1: i32) -> (i32, i32) {
    %c0_i32 = arith.constant 0 : i32
    %c0_i32_0 = arith.constant 0 : i32
    return %arg0, %c0_i32 : i32, i32
  }
}

module attributes {stable_mosaic.version = 11 : i64} {
  func.func @_bn_lrelu_nchw_kernel(%arg0: i32, %arg1: i32, %arg2: memref<64x128xbf16, #tpu.memory_space<vmem>>, %arg3: memref<1x128xf32, #tpu.memory_space<vmem>>, %arg4: memref<1x128xf32, #tpu.memory_space<vmem>>, %arg5: memref<1x128xf32, #tpu.memory_space<vmem>>, %arg6: memref<1x128xf32, #tpu.memory_space<vmem>>, %arg7: memref<1x128x64xbf16, #tpu.memory_space<vmem>>) attributes {dimension_semantics = [#tpu.dimension_semantics<parallel>, #tpu.dimension_semantics<parallel>], iteration_bounds = array<i64: 2, 1>, scalar_prefetch = 0 : i64, scratch_operands = 0 : i64, tpu.core_type = #tpu.core_type<tc>, window_params = [{transform_indices = @transform_0, window_bounds = array<i64: 64, 128>}, {pipeline_mode = #tpu.pipeline_mode<synchronous>, transform_indices = @transform_1, window_bounds = array<i64: 1, 128>}, {pipeline_mode = #tpu.pipeline_mode<synchronous>, transform_indices = @transform_2, window_bounds = array<i64: 1, 128>}, {pipeline_mode = #tpu.pipeline_mode<synchronous>, transform_indices = @transform_3, window_bounds = array<i64: 1, 128>}, {pipeline_mode = #tpu.pipeline_mode<synchronous>, transform_indices = @transform_4, window_bounds = array<i64: 1, 128>}, {transform_indices = @transform_5, window_bounds = array<i64: 1, 128, 64>}]} {
    %c0 = arith.constant 0 : index
    %c0_0 = arith.constant 0 : index
    %0 = vector.load %arg3[%c0, %c0_0] : memref<1x128xf32, #tpu.memory_space<vmem>>, vector<1x128xf32>
    %cst = arith.constant 7.812500e-03 : f32
    %1 = vector.broadcast %cst : f32 to vector<1x128xf32>
    %2 = arith.mulf %0, %1 : vector<1x128xf32>
    %c0_1 = arith.constant 0 : index
    %c0_2 = arith.constant 0 : index
    %3 = vector.load %arg4[%c0_1, %c0_2] : memref<1x128xf32, #tpu.memory_space<vmem>>, vector<1x128xf32>
    %cst_3 = arith.constant 7.812500e-03 : f32
    %4 = vector.broadcast %cst_3 : f32 to vector<1x128xf32>
    %5 = arith.mulf %3, %4 : vector<1x128xf32>
    %6 = arith.mulf %2, %2 : vector<1x128xf32>
    %7 = arith.subf %5, %6 : vector<1x128xf32>
    %c0_4 = arith.constant 0 : index
    %c0_5 = arith.constant 0 : index
    %8 = vector.load %arg5[%c0_4, %c0_5] : memref<1x128xf32, #tpu.memory_space<vmem>>, vector<1x128xf32>
    %cst_6 = arith.constant 9.99999974E-6 : f32
    %9 = vector.broadcast %cst_6 : f32 to vector<1x128xf32>
    %10 = arith.addf %7, %9 : vector<1x128xf32>
    %11 = math.rsqrt %10 : vector<1x128xf32>
    %12 = arith.mulf %8, %11 : vector<1x128xf32>
    %c0_7 = arith.constant 0 : index
    %c0_8 = arith.constant 0 : index
    %13 = vector.load %arg6[%c0_7, %c0_8] : memref<1x128xf32, #tpu.memory_space<vmem>>, vector<1x128xf32>
    %14 = arith.mulf %2, %12 : vector<1x128xf32>
    %15 = arith.subf %13, %14 : vector<1x128xf32>
    %c0_9 = arith.constant 0 : index
    %c0_10 = arith.constant 0 : index
    %16 = vector.load %arg2[%c0_9, %c0_10] : memref<64x128xbf16, #tpu.memory_space<vmem>>, vector<64x128xbf16>
    %17 = arith.extf %16 : vector<64x128xbf16> to vector<64x128xf32>
    %18 = vector.broadcast %12 : vector<1x128xf32> to vector<64x128xf32>
    %19 = arith.mulf %17, %18 : vector<64x128xf32>
    %20 = vector.broadcast %15 : vector<1x128xf32> to vector<64x128xf32>
    %21 = arith.addf %19, %20 : vector<64x128xf32>
    %cst_11 = arith.constant 0.000000e+00 : f32
    %22 = vector.broadcast %cst_11 : f32 to vector<64x128xf32>
    %23 = arith.cmpf oge, %21, %22 : vector<64x128xf32>
    %cst_12 = arith.constant 2.000000e-01 : f32
    %24 = vector.broadcast %cst_12 : f32 to vector<64x128xf32>
    %25 = arith.mulf %24, %21 : vector<64x128xf32>
    %26 = arith.select %23, %21, %25 : vector<64x128xi1>, vector<64x128xf32>
    %27 = tpu.transpose %26, [1, 0] : vector<64x128xf32> -> vector<128x64xf32>
    %28 = arith.truncf %27 : vector<128x64xf32> to vector<128x64xbf16>
    %c0_13 = arith.constant 0 : index
    %c0_14 = arith.constant 0 : index
    %c0_15 = arith.constant 0 : index
    %29 = vector.load %arg7[%c0_13, %c0_14, %c0_15] : memref<1x128x64xbf16, #tpu.memory_space<vmem>>, vector<1x128x64xbf16>
    %30 = vector.shape_cast %29 : vector<1x128x64xbf16> to vector<128x64xbf16>
    %31 = vector.shape_cast %28 : vector<128x64xbf16> to vector<1x128x64xbf16>
    tpu.vector_store %arg7[%c0_13, %c0_14, %c0_15], %31 {strides = array<i32>} : memref<1x128x64xbf16, #tpu.memory_space<vmem>>, vector<1x128x64xbf16>,
    return
  }
  func.func @transform_0(%arg0: i32, %arg1: i32) -> (i32, i32) {
    %c1_i32 = arith.constant 1 : i32
    %0 = arith.muli %arg0, %c1_i32 : i32
    %1 = arith.addi %0, %arg1 : i32
    %c0_i32 = arith.constant 0 : i32
    %c0_i32_0 = arith.constant 0 : i32
    return %1, %c0_i32 : i32, i32
  }
  func.func @transform_1(%arg0: i32, %arg1: i32) -> (i32, i32) {
    %c0_i32 = arith.constant 0 : i32
    %c0_i32_0 = arith.constant 0 : i32
    %c0_i32_1 = arith.constant 0 : i32
    return %c0_i32, %c0_i32_0 : i32, i32
  }
  func.func @transform_2(%arg0: i32, %arg1: i32) -> (i32, i32) {
    %c0_i32 = arith.constant 0 : i32
    %c0_i32_0 = arith.constant 0 : i32
    %c0_i32_1 = arith.constant 0 : i32
    return %c0_i32, %c0_i32_0 : i32, i32
  }
  func.func @transform_3(%arg0: i32, %arg1: i32) -> (i32, i32) {
    %c0_i32 = arith.constant 0 : i32
    %c0_i32_0 = arith.constant 0 : i32
    %c0_i32_1 = arith.constant 0 : i32
    return %c0_i32, %c0_i32_0 : i32, i32
  }
  func.func @transform_4(%arg0: i32, %arg1: i32) -> (i32, i32) {
    %c0_i32 = arith.constant 0 : i32
    %c0_i32_0 = arith.constant 0 : i32
    %c0_i32_1 = arith.constant 0 : i32
    return %c0_i32, %c0_i32_0 : i32, i32
  }
  func.func @transform_5(%arg0: i32, %arg1: i32) -> (i32, i32, i32) {
    %c0_i32 = arith.constant 0 : i32
    %c0_i32_0 = arith.constant 0 : i32
    return %arg0, %c0_i32, %arg1 : i32, i32, i32
  }
}

</mosaic_0001>

<bundles_post_ra>
// kernel: dcgan_conv_forward.3
= control target key start
LH: loop header
LB: loop body
LE: loop exit
PB: predicated region body
PF: predicated region fallthrough
CT: control target
= control target key end

     0   :  { %s592_s18 = smov 0   ;;  %s594_s19 = smov 0   ;;  %s682_s0 = inlined_call_operand.vmem [shape: bf16[128,128], index: 0, kind: input, shape index: {}]   ;;  %s683_s1 = inlined_call_operand.vmem [shape: f32[1,128], index: 1, kind: input, shape index: {}]   ;;  %s684_s2 = inlined_call_operand.vmem [shape: f32[1,128], index: 2, kind: input, shape index: {}]   ;;  %s685_s3 = inlined_call_operand.vmem [shape: f32[1,128], index: 3, kind: input, shape index: {}]   ;;  %s686_s4 = inlined_call_operand.vmem [shape: f32[1,128], index: 4, kind: input, shape index: {}]   ;;  %s687_s5 = inlined_call_operand.vmem [shape: bf16[2,128,64], index: 5, kind: output, shape index: {}]  }
   0x1   :  { %s596_s20 = smov 0  }
   0x2 LB: > { %s27_s21 = sadd.s32 1, %s556_s19  ;;  %p484_p0 = scmp.ge.s32.totalorder %s560_s20, 1  ;;  %s560_s20 = sphi %s596_s20, %s15_s20   ;;  %s556_s19 = sphi %s594_s19, %s689_s19   ;;  %s552_s18 = sphi %s592_s18, %s688_s18  }
   0x3   : > { %p29_p1 = scmp.ge.s32.totalorder %s27_s21, 2  ;;  %p206_p2 = scmp.lt.s32.totalorder %s560_s20, 3 }
   0x5   : > { %s691_s21 = smov (%p29_p1, %s27_s21), 0  ;;  %p207_p3 = pnand %p484_p0, %p206_p2 }
   0x6   : > { %s485_s26 = sshll.u32 (!%p207_p3), %s552_s18, 3  ;;  %p246_p5 = scmp.lt.s32.totalorder (!%p207_p3), %s552_s18, 1 }
   0x7   : > { %210 = sbr.rel (%p207_p3) target bundleno = 340 (0x154), region = 40  ;;  %p240_p4 = scmp.lt.s32.totalorder (!%p207_p3), %s485_s26, 15 }
   0xc   : > { %v254_v0 = vld [vmem:[%s683_s1] sm:$0x1]  ;;  %s693_s26 = smov (!%p240_p4, %s485_s26), 15  ;;  %s695_s18 = smov (!%p246_p5, %s552_s18), 1  ;;  %vm386_vm11 = vcmask 519168  }
   0xd   : > { %v256_v1 = vld [vmem:[%s684_s2] sm:$0x1]  ;;  %v255_v2 = vmul.f32 0.0078125, %v254_v0  ;;  %s486_s27 = sshll.u32 %s693_s26, 2  ;;  %s491_s10 = sshll.u32 %s695_s18, 6 }
   0xe   : > { %v257_v3 = vmul.f32 0.0078125, %v256_v1  ;;  %s622_s30 = scalar_lea.vmem %s682_s0, %s486_s27  ;;  %v260_v12 = vld [vmem:[%s685_s3] sm:$0x1]  ;;  %s639_s13 = scalar_lea.vmem %s687_s5, %s491_s10 }
   0xf   : > { %v258_v4 = vmul.f32 %v255_v2, %v255_v2  ;;  %v493_v14 = vld [vmem:[%s622_s30] sm:$0xff]   ;;  %v508_v26 = vld [vmem:[%s622_s30 + $0x8] sm:$0xff]   ;;  %v509_v39 = vld [vmem:[%s622_s30 + $0x10] sm:$0xff]  }
  0x10   : > { %v494_v17 = vunpack.c.l.bf16 %v493_v14  ;;  %v273_v18 = vld [vmem:[%s686_s4] sm:$0x1]  ;;  %v495_v21 = vunpack.c.h.bf16 %v493_v14  ;;  %v498_v30 = vunpack.c.l.bf16 %v508_v26  ;;  %v499_v36 = vunpack.c.h.bf16 %v508_v26  ;;  %v510_v50 = vld [vmem:[%s622_s30 + $0x18] sm:$0xff]  }
  0x11   : > { %v259_v5 = vsub.f32 %v257_v3, %v258_v4  ;;  %v502_v42 = vunpack.c.l.bf16 %v509_v39  ;;  %v503_v47 = vunpack.c.h.bf16 %v509_v39  ;;  %v506_v53 = vunpack.c.l.bf16 %v510_v50 }
  0x12   : > { %v507_v58 = vunpack.c.h.bf16 %v510_v50 }
  0x13   : > { %v261_v6 = vadd.f32 1e-05, %v259_v5 }
  0x15   : > { %536 = vrsqrt.f32 %v261_v6  ;;  %vm268_vm0 = vweird.f32 %v261_v6 }
  0x1b   : > { %v537_v7 = vpop.eup %536 }
  0x1c   : > { %v263_v8 = vmul.f32 %v537_v7, %v261_v6  ;;  %vm269_vm1 = vweird.f32 %v537_v7 }
  0x1d   : > { %vm270_vm2 = vmor %vm268_vm0, %vm269_vm1 }
  0x1e   : > { %v264_v9 = vmul.f32 %v537_v7, %v263_v8 }
  0x20   : > { %v265_v10 = vmul.f32 0.5, %v264_v9 }
  0x22   : > { %v266_v11 = vsub.f32 1.5, %v265_v10 }
  0x24   : > { %v267_v13 = vmul.f32 %v537_v7, %v266_v11 }
  0x26   : > { %v271_v15 = vsel %vm270_vm2, %v537_v7, %v267_v13 }
  0x27   : > { %v272_v16 = vmul.f32 %v271_v15, %v260_v12 }
  0x29   : > { %v274_v19 = vmul.f32 %v272_v16, %v255_v2  ;;  %v293_v20 = vperm.slane %v272_v16, 0 }
  0x2b   : > { %v275_v22 = vsub.f32 %v273_v18, %v274_v19  ;;  %v295_v23 = vmul.f32 %v494_v17, %v293_v20  ;;  %v296_v25 = vmul.f32 %v495_v21, %v293_v20  ;;  %v297_v33 = vmul.f32 %v498_v30, %v293_v20 }
  0x2c   : > { %v298_v38 = vmul.f32 %v499_v36, %v293_v20  ;;  %v299_v44 = vmul.f32 %v502_v42, %v293_v20  ;;  %v300_v49 = vmul.f32 %v503_v47, %v293_v20  ;;  %v301_v55 = vmul.f32 %v506_v53, %v293_v20 }
  0x2d   : > { %v304_v24 = vperm.slane %v275_v22, 0  ;;  %v302_v60 = vmul.f32 %v507_v58, %v293_v20 }
  0x2f   : > { %v306_v27 = vadd.f32 %v304_v24, %v295_v23  ;;  %v307_v29 = vadd.f32 %v304_v24, %v296_v25  ;;  %v308_v35 = vadd.f32 %v304_v24, %v297_v33  ;;  %v309_v41 = vadd.f32 %v304_v24, %v298_v38 }
  0x30   : > { %v310_v46 = vadd.f32 %v304_v24, %v299_v44  ;;  %v311_v52 = vadd.f32 %v304_v24, %v300_v49  ;;  %v312_v57 = vadd.f32 %v304_v24, %v301_v55  ;;  %v313_v62 = vadd.f32 %v304_v24, %v302_v60 }
  0x31   : > { %vm314_vm3 = vcmp.ge.f32.partialorder %v306_v27, 0.0  ;;  %v322_v28 = vmul.f32 0.2, %v306_v27  ;;  %v323_v32 = vmul.f32 0.2, %v307_v29  ;;  %vm315_vm4 = vcmp.ge.f32.partialorder %v307_v29, 0.0 }
  0x32   : > { %v324_v37 = vmul.f32 0.2, %v308_v35  ;;  %vm316_vm5 = vcmp.ge.f32.partialorder %v308_v35, 0.0  ;;  %v325_v43 = vmul.f32 0.2, %v309_v41  ;;  %vm317_vm6 = vcmp.ge.f32.partialorder %v309_v41, 0.0 }
  0x33   : > { %v330_v31 = vsel %vm314_vm3, %v306_v27, %v322_v28  ;;  %v331_v34 = vsel %vm315_vm4, %v307_v29, %v323_v32  ;;  %v326_v48 = vmul.f32 0.2, %v310_v46  ;;  %vm318_vm7 = vcmp.ge.f32.partialorder %v310_v46, 0.0 }
  0x34   : > { %338 = vxpose.xlu0.b32.start [1/8] (short) %v330_v31, 128  ;;  %v332_v40 = vsel %vm316_vm5, %v308_v35, %v324_v37  ;;  %v333_v45 = vsel %vm317_vm6, %v309_v41, %v325_v43  ;;  %v327_v54 = vmul.f32 0.2, %v311_v52  ;;  %vm319_vm8 = vcmp.ge.f32.partialorder %v311_v52, 0.0 }
  0x35   : > { %v334_v51 = vsel %vm318_vm7, %v310_v46, %v326_v48  ;;  %v328_v59 = vmul.f32 0.2, %v312_v57  ;;  %vm320_vm9 = vcmp.ge.f32.partialorder %v312_v57, 0.0  ;;  %v329_v63 = vmul.f32 0.2, %v313_v62 }
  0x36   : > { %v335_v56 = vsel %vm319_vm8, %v311_v52, %v327_v54  ;;  %vm321_vm10 = vcmp.ge.f32.partialorder %v313_v62, 0.0 }
  0x37   : > { %v336_v61 = vsel %vm320_vm9, %v312_v57, %v328_v59  ;;  %v337_v0 = vsel %vm321_vm10, %v313_v62, %v329_v63 }
  0x3c   : > { %339 = vxpose.xlu0.b32.cont [2/8] (short) %v331_v34, 128 }
  0x44   : > { %340 = vxpose.xlu0.b32.cont [3/8] (short) %v332_v40, 128 }
  0x4c   : > { %341 = vxpose.xlu0.b32.cont [4/8] (short) %v333_v45, 128 }
  0x54   : > { %342 = vxpose.xlu0.b32.cont [5/8] (short) %v334_v51, 128 }
  0x5c   : > { %343 = vxpose.xlu0.b32.cont [6/8] (short) %v335_v56, 128 }
  0x64   : > { %344 = vxpose.xlu0.b32.cont [7/8] (short) %v336_v61, 128 }
  0x6c   : > { %345 = vxpose.xlu0.b32.end [8/8] (short) %v337_v0, 128 }
  0xd8   : > { %v354_v1 = vpop.trf.xlu0 }
  0xd9   : > { %v370_v2 = vpack.c.bf16 %v354_v1, %v354_v1 }
  0xdb   : > { %387 = vst.msk [vmem:[%s639_s13] sm:$0xf] %vm386_vm11, %v370_v2 }
  0xe0   : > { %v355_v3 = vpop.trf.xlu0 }
  0xe1   : > { %v371_v4 = vpack.c.bf16 %v355_v3, %v355_v3 }
  0xe3   : > { %388 = vst.msk [vmem:[%s639_s13 + $0x4] sm:$0xf] %vm386_vm11, %v371_v4 }
  0xe8   : > { %v356_v5 = vpop.trf.xlu0 }
  0xe9   : > { %v372_v6 = vpack.c.bf16 %v356_v5, %v356_v5 }
  0xeb   : > { %389 = vst.msk [vmem:[%s639_s13 + $0x8] sm:$0xf] %vm386_vm11, %v372_v6 }
  0xf0   : > { %v357_v7 = vpop.trf.xlu0 }
  0xf1   : > { %v373_v8 = vpack.c.bf16 %v357_v7, %v357_v7 }
  0xf3   : > { %390 = vst.msk [vmem:[%s639_s13 + $0xc] sm:$0xf] %vm386_vm11, %v373_v8 }
  0xf8   : > { %v358_v9 = vpop.trf.xlu0 }
  0xf9   : > { %v374_v10 = vpack.c.bf16 %v358_v9, %v358_v9 }
  0xfb   : > { %391 = vst.msk [vmem:[%s639_s13 + $0x10] sm:$0xf] %vm386_vm11, %v374_v10 }
 0x100   : > { %v359_v11 = vpop.trf.xlu0 }
 0x101   : > { %v375_v12 = vpack.c.bf16 %v359_v11, %v359_v11 }
 0x103   : > { %392 = vst.msk [vmem:[%s639_s13 + $0x14] sm:$0xf] %vm386_vm11, %v375_v12 }
 0x108   : > { %v360_v13 = vpop.trf.xlu0 }
 0x109   : > { %v376_v14 = vpack.c.bf16 %v360_v13, %v360_v13 }
 0x10b   : > { %393 = vst.msk [vmem:[%s639_s13 + $0x18] sm:$0xf] %vm386_vm11, %v376_v14 }
 0x110   : > { %v361_v15 = vpop.trf.xlu0 }
 0x111   : > { %v377_v16 = vpack.c.bf16 %v361_v15, %v361_v15 }
 0x113   : > { %394 = vst.msk [vmem:[%s639_s13 + $0x1c] sm:$0xf] %vm386_vm11, %v377_v16 }
 0x118   : > { %v362_v17 = vpop.trf.xlu0 }
 0x119   : > { %v378_v18 = vpack.c.bf16 %v362_v17, %v362_v17 }
 0x11b   : > { %395 = vst.msk [vmem:[%s639_s13 + $0x20] sm:$0xf] %vm386_vm11, %v378_v18 }
 0x120   : > { %v363_v19 = vpop.trf.xlu0 }
 0x121   : > { %v379_v20 = vpack.c.bf16 %v363_v19, %v363_v19 }
 0x123   : > { %396 = vst.msk [vmem:[%s639_s13 + $0x24] sm:$0xf] %vm386_vm11, %v379_v20 }
 0x128   : > { %v364_v21 = vpop.trf.xlu0 }
 0x129   : > { %v380_v22 = vpack.c.bf16 %v364_v21, %v364_v21 }
 0x12b   : > { %397 = vst.msk [vmem:[%s639_s13 + $0x28] sm:$0xf] %vm386_vm11, %v380_v22 }
 0x130   : > { %v365_v23 = vpop.trf.xlu0 }
 0x131   : > { %v381_v24 = vpack.c.bf16 %v365_v23, %v365_v23 }
 0x133   : > { %398 = vst.msk [vmem:[%s639_s13 + $0x2c] sm:$0xf] %vm386_vm11, %v381_v24 }
 0x138   : > { %v366_v25 = vpop.trf.xlu0 }
 0x139   : > { %v382_v26 = vpack.c.bf16 %v366_v25, %v366_v25 }
 0x13b   : > { %399 = vst.msk [vmem:[%s639_s13 + $0x30] sm:$0xf] %vm386_vm11, %v382_v26 }
 0x140   : > { %v367_v27 = vpop.trf.xlu0 }
 0x141   : > { %v383_v28 = vpack.c.bf16 %v367_v27, %v367_v27 }
 0x143   : > { %400 = vst.msk [vmem:[%s639_s13 + $0x34] sm:$0xf] %vm386_vm11, %v383_v28 }
 0x148   : > { %v368_v29 = vpop.trf.xlu0 }
 0x149   : > { %v384_v30 = vpack.c.bf16 %v368_v29, %v368_v29 }
 0x14b   : > { %401 = vst.msk [vmem:[%s639_s13 + $0x38] sm:$0xf] %vm386_vm11, %v384_v30 }
 0x150   : > { %v369_v31 = vpop.trf.xlu0 }
 0x151   : > { %v385_v32 = vpack.c.bf16 %v369_v31, %v369_v31 }
 0x153   : > { %402 = vst.msk [vmem:[%s639_s13 + $0x3c] sm:$0xf] %vm386_vm11, %v385_v32 }
 0x154 PF: > { %s15_s20 = sadd.s32 1, %s560_s20   ;;  %s688_s18 = smov %s556_s19 }
 0x155   : > { %p12_p6 = scmp.ge.s32.totalorder %s15_s20, 4   ;;  %s689_s19 = smov %s691_s21 }
 0x157   :  { %14 = sbr.rel (!%p12_p6) target bundleno = 2 (0x2), region = 70 }

// kernel: dcgan_conv_forward.2
= control target key start
LH: loop header
LB: loop body
LE: loop exit
PB: predicated region body
PF: predicated region fallthrough
CT: control target
= control target key end

     0   :  { %s758_s15 = smov 0   ;;  %s760_s16 = smov 0   ;;  %s843_s0 = inlined_call_operand.vmem [shape: bf16[128,128], index: 0, kind: input, shape index: {}]   ;;  %s844_s1 = inlined_call_operand.vmem [shape: bf16[128,128], index: 1, kind: input, shape index: {}]   ;;  %s845_s2 = inlined_call_operand.vmem [shape: bf16[128,128], index: 2, kind: output, shape index: {0}]   ;;  %s846_s3 = inlined_call_operand.vmem [shape: f32[16,128], index: 3, kind: output, shape index: {1}]   ;;  %s847_s4 = inlined_call_operand.vmem [shape: f32[16,128], index: 4, kind: output, shape index: {2}]  }
   0x1   :  { %s762_s17 = smov 0  }
   0x2 LB: > { %s27_s18 = sadd.s32 1, %s726_s16  ;;  %p567_p0 = scmp.ge.s32.totalorder %s730_s17, 1  ;;  %s730_s17 = sphi %s762_s17, %s15_s17   ;;  %s726_s16 = sphi %s760_s16, %s849_s16   ;;  %s722_s15 = sphi %s758_s15, %s848_s15  }
   0x3   : > { %p29_p1 = scmp.ge.s32.totalorder %s27_s18, 2  ;;  %p186_p2 = scmp.lt.s32.totalorder %s730_s17, 3 }
   0x5   : > { %s851_s18 = smov (%p29_p1, %s27_s18), 0  ;;  %p187_p3 = pnand %p567_p0, %p186_p2 }
   0x6   : > { %s568_s27 = sshll.u32 (!%p187_p3), %s722_s15, 3  ;;  %p238_p5 = scmp.lt.s32.totalorder (!%p187_p3), %s722_s15, 1 }
   0x7   : > { %190 = sbr.rel (%p187_p3) target bundleno = 209 (0xd1), region = 28  ;;  %p224_p4 = scmp.lt.s32.totalorder (!%p187_p3), %s568_s27, 15 }
   0xc   : > { %v635_v0 = vld [vmem:[%s844_s1 + $0x38] sm:$0xff]  ;;  %v634_v1 = vld [vmem:[%s844_s1 + $0x30] sm:$0xff]  ;;  %v633_v2 = vld [vmem:[%s844_s1 + $0x28] sm:$0xff]  ;;  %s853_s27 = smov (!%p224_p4, %s568_s27), 15  ;;  %s855_s15 = smov (!%p238_p5, %s722_s15), 1  ;;  %v732_v12 = vmov 0.0  }
   0xd   : > { %348 = vmatpush.bf16.msra.mxu0 %v635_v0  ;;  %659 = vmatpush.bf16.msra.mxu1 %v635_v0  ;;  %v632_v3 = vld [vmem:[%s844_s1 + $0x20] sm:$0xff]  ;;  %v631_v4 = vld [vmem:[%s844_s1 + $0x18] sm:$0xff]  ;;  %v630_v5 = vld [vmem:[%s844_s1 + $0x10] sm:$0xff]  ;;  %s569_s8 = sshll.u32 %s853_s27, 2  ;;  %s572_s14 = sshll.u32 %s855_s15, 3 }
   0xe   : > { %660 = vmatpush.bf16.msra.mxu2 %v635_v0  ;;  %661 = vmatpush.bf16.msra.mxu3 %v635_v0  ;;  %v629_v6 = vld [vmem:[%s844_s1 + $0x8] sm:$0xff]  ;;  %v628_v7 = vld [vmem:[%s844_s1] sm:$0xff]  ;;  %s227_s13 = scalar_lea.vmem %s843_s0, %s569_s8  ;;  %s816_s21 = scalar_lea.vmem %s846_s3, %s572_s14 }
   0xf   : > { %v624_v8 = vld [vmem:[%s227_s13] sm:$0xff]  ;;  %v625_v9 = vld [vmem:[%s227_s13 + $0x8] sm:$0xff]  ;;  %v626_v10 = vld [vmem:[%s227_s13 + $0x10] sm:$0xff]  ;;  %s821_s24 = scalar_lea.vmem %s847_s4, %s572_s14  ;;  %250 = vst [vmem:[%s816_s21] sm:$0xff] %v732_v12  ;;  %s235_s26 = scalar_lea.vmem %s845_s2, %s569_s8 }
  0x10   : > { %v627_v11 = vld [vmem:[%s227_s13 + $0x18] sm:$0xff]  ;;  %251 = vst [vmem:[%s821_s24] sm:$0xff] %v732_v12 }
  0x11   : > { %349 = vmatpush.bf16.msra.mxu0 %v634_v1  ;;  %662 = vmatpush.bf16.msra.mxu1 %v634_v1 }
  0x12   : > { %663 = vmatpush.bf16.msra.mxu2 %v634_v1  ;;  %664 = vmatpush.bf16.msra.mxu3 %v634_v1 }
  0x15   : > { %350 = vmatpush.bf16.msra.mxu0 %v633_v2  ;;  %665 = vmatpush.bf16.msra.mxu1 %v633_v2 }
  0x16   : > { %666 = vmatpush.bf16.msra.mxu2 %v633_v2  ;;  %667 = vmatpush.bf16.msra.mxu3 %v633_v2  ;;  %v393_v56 = vld [vmem:[%s816_s21] sm:$0x1] }
  0x17   : > { %v409_v59 = vld [vmem:[%s821_s24] sm:$0x1] }
  0x19   : > { %351 = vmatpush.bf16.msra.mxu0 %v632_v3  ;;  %668 = vmatpush.bf16.msra.mxu1 %v632_v3 }
  0x1a   : > { %669 = vmatpush.bf16.msra.mxu2 %v632_v3  ;;  %670 = vmatpush.bf16.msra.mxu3 %v632_v3 }
  0x1d   : > { %352 = vmatpush.bf16.msra.mxu0 %v631_v4  ;;  %671 = vmatpush.bf16.msra.mxu1 %v631_v4 }
  0x1e   : > { %672 = vmatpush.bf16.msra.mxu2 %v631_v4  ;;  %673 = vmatpush.bf16.msra.mxu3 %v631_v4 }
  0x21   : > { %353 = vmatpush.bf16.msra.mxu0 %v630_v5  ;;  %674 = vmatpush.bf16.msra.mxu1 %v630_v5 }
  0x22   : > { %675 = vmatpush.bf16.msra.mxu2 %v630_v5  ;;  %676 = vmatpush.bf16.msra.mxu3 %v630_v5 }
  0x25   : > { %354 = vmatpush.bf16.msra.mxu0 %v629_v6  ;;  %677 = vmatpush.bf16.msra.mxu1 %v629_v6 }
  0x26   : > { %678 = vmatpush.bf16.msra.mxu2 %v629_v6  ;;  %679 = vmatpush.bf16.msra.mxu3 %v629_v6 }
  0x29   : > { %355 = vmatpush.bf16.msra.mxu0 %v628_v7  ;;  %680 = vmatpush.bf16.msra.mxu1 %v628_v7 }
  0x2a   : > { %681 = vmatpush.bf16.msra.mxu2 %v628_v7  ;;  %682 = vmatpush.bf16.msra.mxu3 %v628_v7 }
  0x2c   : > { %356 = vmatmul.bf16.vlgmr.msra.gmra.mxu0 %v624_v8  ;;  %361 = vmatmul.bf16.vlgmr.msra.gmra.mxu1 %v625_v9 }
  0x2d   : > { %366 = vmatmul.bf16.vlgmr.msra.gmra.mxu2 %v626_v10  ;;  %371 = vmatmul.bf16.vlgmr.msra.gmra.mxu3 %v627_v11 }
  0xa9   : > { %v357_v13 = vpop.f32.mrf.mxu0  ;;  %v362_v14 = vpop.f32.mrf.mxu1 }
  0xaa   : > { %v410_v17 = vmul.f32 %v357_v13, %v357_v13  ;;  %v412_v24 = vmul.f32 %v362_v14, %v362_v14 }
  0xb0   : > { %v367_v15 = vpop.f32.mrf.mxu2  ;;  %v372_v16 = vpop.f32.mrf.mxu3 }
  0xb1   : > { %v359_v18 = vpop.f32.mrf.mxu0  ;;  %v364_v19 = vpop.f32.mrf.mxu1  ;;  %v414_v30 = vmul.f32 %v367_v15, %v367_v15  ;;  %v416_v40 = vmul.f32 %v372_v16, %v372_v16 }
  0xb2   : > { %v639_v20 = vpack.c.bf16 %v359_v18, %v357_v13  ;;  %v394_v21 = vadd.f32 %v359_v18, %v357_v13  ;;  %v411_v22 = vmul.f32 %v359_v18, %v359_v18  ;;  %v644_v23 = vpack.c.bf16 %v364_v19, %v362_v14 }
  0xb3   : > { %v413_v28 = vmul.f32 %v364_v19, %v364_v19 }
  0xb4   : > { %640 = vst [vmem:[%s235_s26] sm:$0xff] %v639_v20   ;;  %v418_v25 = vadd.f32 %v411_v22, %v410_v17  ;;  %v395_v26 = vadd.f32 %v394_v21, %v362_v14 }
  0xb5   : > { %656 = vst [vmem:[%s235_s26 + $0x8] sm:$0xff] %v644_v23  }
  0xb6   : > { %v396_v27 = vadd.f32 %v395_v26, %v364_v19  ;;  %v419_v29 = vadd.f32 %v418_v25, %v412_v24 }
  0xb8   : > { %v420_v31 = vadd.f32 %v419_v29, %v413_v28  ;;  %v369_v32 = vpop.f32.mrf.mxu2  ;;  %v397_v33 = vadd.f32 %v396_v27, %v367_v15  ;;  %v374_v34 = vpop.f32.mrf.mxu3 }
  0xb9   : > { %v649_v35 = vpack.c.bf16 %v369_v32, %v367_v15  ;;  %v654_v36 = vpack.c.bf16 %v374_v34, %v372_v16  ;;  %v415_v38 = vmul.f32 %v369_v32, %v369_v32  ;;  %v417_v44 = vmul.f32 %v374_v34, %v374_v34 }
  0xba   : > { %v398_v37 = vadd.f32 %v397_v33, %v369_v32  ;;  %v421_v39 = vadd.f32 %v420_v31, %v414_v30 }
  0xbb   : > { %657 = vst [vmem:[%s235_s26 + $0x10] sm:$0xff] %v649_v35  }
  0xbc   : > { %v422_v41 = vadd.f32 %v421_v39, %v415_v38  ;;  %658 = vst [vmem:[%s235_s26 + $0x18] sm:$0xff] %v654_v36   ;;  %v399_v42 = vadd.f32 %v398_v37, %v372_v16 }
  0xbe   : > { %v400_v43 = vadd.f32 %v399_v42, %v374_v34  ;;  %v423_v45 = vadd.f32 %v422_v41, %v416_v40 }
  0xc0   : > { %v401_v46 = vrot.slane %v400_v43, 4  ;;  %v424_v47 = vadd.f32 %v423_v45, %v417_v44 }
  0xc2   : > { %v402_v48 = vadd.f32 %v401_v46, %v400_v43  ;;  %v425_v49 = vrot.slane %v424_v47, 4 }
  0xc4   : > { %v403_v50 = vrot.slane %v402_v48, 2  ;;  %v426_v51 = vadd.f32 %v425_v49, %v424_v47 }
  0xc6   : > { %v404_v52 = vadd.f32 %v403_v50, %v402_v48  ;;  %v427_v53 = vrot.slane %v426_v51, 2 }
  0xc8   : > { %v405_v54 = vrot.slane %v404_v52, 1  ;;  %v428_v55 = vadd.f32 %v427_v53, %v426_v51 }
  0xca   : > { %v406_v57 = vadd.f32 %v405_v54, %v404_v52  ;;  %v429_v58 = vrot.slane %v428_v55, 1 }
  0xcc   : > { %v407_v60 = vadd.f32 %v406_v57, %v393_v56  ;;  %v430_v61 = vadd.f32 %v429_v58, %v428_v55 }
  0xce   : > { %408 = vst [vmem:[%s816_s21] sm:$0x1] %v407_v60  ;;  %v431_v62 = vadd.f32 %v430_v61, %v409_v59 }
  0xd0   : > { %432 = vst [vmem:[%s821_s24] sm:$0x1] %v431_v62 }
  0xd1 PF: > { %s15_s17 = sadd.s32 1, %s730_s17   ;;  %s848_s15 = smov %s726_s16 }
  0xd2   : > { %p12_p6 = scmp.ge.s32.totalorder %s15_s17, 4   ;;  %s849_s16 = smov %s851_s18 }
  0xd4   :  { %14 = sbr.rel (!%p12_p6) target bundleno = 2 (0x2), region = 86 }

</bundles_post_ra>
